<compile_context>
chip_gen: v5e
topology: v5e:2x2
jax: 0.10.0
libtpu: 0.0.40
codegen_flags: <defaults>
</compile_context>

<pallas_src>
import functools
import math

import jax
import jax.numpy as jnp
from jax import lax
from jax.experimental import pallas as pl
from jax.experimental.pallas import tpu as pltpu


def _round_up(x, m):
    return (x + m - 1) // m * m


def _gelu(y):
    # tanh-approx GELU (PyTorch F.gelu uses erf; difference is negligible)
    c = jnp.float32(0.7978845608028654)
    return 0.5 * y * (1.0 + jnp.tanh(c * (y + 0.044715 * y * y * y)))


# ----------------------- tiled matmul (+ bias + act + residual) -------------------

def _matmul_kernel(x_ref, w_ref, b_ref, *rest, act, has_residual):
    if has_residual:
        r_ref, o_ref, acc_ref = rest
    else:
        o_ref, acc_ref = rest
        r_ref = None

    @pl.when(pl.program_id(2) == 0)
    def _init():
        acc_ref[...] = jnp.zeros(acc_ref.shape, jnp.float32)

    acc_ref[...] += jnp.dot(x_ref[...], w_ref[...],
                            preferred_element_type=jnp.float32)

    @pl.when(pl.program_id(2) == pl.num_programs(2) - 1)
    def _finalize():
        y = acc_ref[...] + b_ref[...]
        if act == "gelu":
            y = _gelu(y)
        elif act == "elu":
            y = jnp.where(y > 0, y, jnp.expm1(y))
        if r_ref is not None:
            y = y + r_ref[...]
        o_ref[...] = y.astype(o_ref.dtype)


def linear(x, w, b, act=None, residual=None, out_dtype=jnp.float32):
    """y = act(x @ w + b) (+ residual): gridded MXU matmul, bf16 ops, f32 accum."""
    lead = x.shape[:-1]
    K = x.shape[-1]
    N = w.shape[-1]
    M = 1
    for d in lead:
        M *= d
    x2 = x.reshape(M, K)

    # row (M) tiling (cap at 256 so larger configs keep a multi-step parallel axis)
    Mp = _round_up(M, 8)
    tm = Mp
    if Mp > 256:
        Mp = _round_up(M, 256)
        tm = 256
    # reduction (K) tiling — innermost grid axis
    if K > 512 and K % 512 == 0:
        tk = 512
    elif K > 256 and K % 256 == 0:
        tk = 256
    else:
        tk = K
    # output (N) tiling, lane-padded to a multiple of 128 for unmasked stores
    Np = _round_up(N, 128)
    if Np % 512 == 0:
        tn = 512
    elif Np % 256 == 0:
        tn = 256
    else:
        tn = 128

    xb = x2.astype(jnp.bfloat16)
    if Mp != M:
        xb = jnp.pad(xb, ((0, Mp - M), (0, 0)))
    wb = w.astype(jnp.bfloat16)
    bf = b.astype(jnp.float32)
    if Np != N:
        wb = jnp.pad(wb, ((0, 0), (0, Np - N)))
        bf = jnp.pad(bf, (0, Np - N))
    bf = bf.reshape(1, Np)

    in_specs = [
        pl.BlockSpec((tm, tk), lambda i, j, k: (i, k)),
        pl.BlockSpec((tk, tn), lambda i, j, k: (k, j)),
        pl.BlockSpec((1, tn), lambda i, j, k: (0, j)),
    ]
    args = [xb, wb, bf]
    has_residual = residual is not None
    if has_residual:
        r2 = residual.reshape(M, N).astype(jnp.float32)
        if Mp != M or Np != N:
            r2 = jnp.pad(r2, ((0, Mp - M), (0, Np - N)))
        in_specs.append(pl.BlockSpec((tm, tn), lambda i, j, k: (i, j)))
        args.append(r2)

    out = pl.pallas_call(
        functools.partial(_matmul_kernel, act=act, has_residual=has_residual),
        out_shape=jax.ShapeDtypeStruct((Mp, Np), out_dtype),
        grid_spec=pltpu.PrefetchScalarGridSpec(
            num_scalar_prefetch=0,
            grid=(Mp // tm, Np // tn, K // tk),
            in_specs=in_specs,
            out_specs=pl.BlockSpec((tm, tn), lambda i, j, k: (i, j)),
            scratch_shapes=[pltpu.VMEM((tm, tn), jnp.float32)],
        ),
        compiler_params=pltpu.CompilerParams(
            dimension_semantics=("parallel", "parallel", "arbitrary"),
        ),
    )(*args)
    return out[:M, :N].reshape(*lead, N)


# --------------------------- fused FFN (conv1 -> act -> conv2) --------------------

def _ffn_kernel(x_ref, w1_ref, b1_ref, w2_ref, b2_ref, o_ref):
    x = x_ref[...]                                          # (tm, D) f32
    h = jnp.dot(x.astype(jnp.bfloat16), w1_ref[...],
                preferred_element_type=jnp.float32) + b1_ref[...]
    h = _gelu(h)
    y = jnp.dot(h.astype(jnp.bfloat16), w2_ref[...],
                preferred_element_type=jnp.float32) + b2_ref[...]
    o_ref[...] = (x + y).astype(o_ref.dtype)                # residual fused


def ffn_residual(x, w1, b1, w2, b2):
    """x + conv2(gelu(conv1(x))) in one pallas_call; (tm, d_ff) stays in VMEM."""
    lead = x.shape[:-1]
    D = x.shape[-1]
    F = w1.shape[-1]
    M = 1
    for d in lead:
        M *= d
    x2 = x.reshape(M, D).astype(jnp.float32)
    Mp = _round_up(M, 8)
    tm = Mp
    if Mp > 256:
        Mp = _round_up(M, 256)
        tm = 256
    if Mp != M:
        x2 = jnp.pad(x2, ((0, Mp - M), (0, 0)))
    out = pl.pallas_call(
        _ffn_kernel,
        out_shape=jax.ShapeDtypeStruct((Mp, D), jnp.float32),
        grid_spec=pltpu.PrefetchScalarGridSpec(
            num_scalar_prefetch=0,
            grid=(Mp // tm,),
            in_specs=[pl.BlockSpec((tm, D), lambda i: (i, 0)),
                      pl.BlockSpec((D, F), lambda i: (0, 0)),
                      pl.BlockSpec((1, F), lambda i: (0, 0)),
                      pl.BlockSpec((F, D), lambda i: (0, 0)),
                      pl.BlockSpec((1, D), lambda i: (0, 0))],
            out_specs=pl.BlockSpec((tm, D), lambda i: (i, 0)),
        ),
        compiler_params=pltpu.CompilerParams(dimension_semantics=("parallel",)),
    )(x2, w1.astype(jnp.bfloat16), b1.reshape(1, F).astype(jnp.float32),
      w2.astype(jnp.bfloat16), b2.reshape(1, D).astype(jnp.float32))
    return out[:M].reshape(*lead, D)


# ------------------------- multi-head flash attention -----------------------------
# All heads of a (batch, q-tile, kv-tile) are processed per grid step in (B, L, D)
# layout; online-softmax state is stored lane-dense as (tq, D) per-head bands.

def _attn_kernel(q_ref, k_ref, v_ref, o_ref, m_sc, l_sc, acc_sc, *,
                 scale, causal, n_heads, lk_valid, tq, tkv, need_kmask):
    kv_i = pl.program_id(2)
    q_i = pl.program_id(1)

    @pl.when(kv_i == 0)
    def _init():
        m_sc[...] = jnp.full(m_sc.shape, -jnp.inf, jnp.float32)
        l_sc[...] = jnp.zeros(l_sc.shape, jnp.float32)
        acc_sc[...] = jnp.zeros(acc_sc.shape, jnp.float32)

    def _body():
        q = q_ref[0]                                        # (tq, D) bf16
        k = k_ref[0]
        v = v_ref[0]
        D = q.shape[-1]
        dh = D // n_heads

        mask = None
        if need_kmask or causal:
            k_idx = kv_i * tkv + lax.broadcasted_iota(jnp.int32, (tq, tkv), 1)
            if need_kmask:
                mask = k_idx < lk_valid
            if causal:
                q_idx = q_i * tq + lax.broadcasted_iota(jnp.int32, (tq, tkv), 0)
                cm = k_idx <= q_idx
                mask = cm if mask is None else jnp.logical_and(mask, cm)

        m_prev = m_sc[...]
        l_prev = l_sc[...]
        acc_prev = acc_sc[...]

        m_parts, linc_parts, pv_parts = [], [], []
        for h in range(n_heads):
            lo = h * dh
            s = lax.dot_general(q[:, lo:lo + dh], k[:, lo:lo + dh],
                                (((1,), (1,)), ((), ())),
                                preferred_element_type=jnp.float32) * scale
            if mask is not None:
                s = jnp.where(mask, s, jnp.float32(-1e30))
            m_h = jnp.maximum(m_prev[:, lo:lo + 1],
                              jnp.max(s, axis=-1, keepdims=True))        # (tq, 1)
            p = jnp.exp(s - m_h)                                          # (tq, tkv)
            linc = jnp.sum(p, axis=-1, keepdims=True)                     # (tq, 1)
            pv = jnp.dot(p.astype(v.dtype), v[:, lo:lo + dh],
                         preferred_element_type=jnp.float32)              # (tq, dh)
            m_parts.append(jnp.broadcast_to(m_h, (tq, dh)))
            linc_parts.append(jnp.broadcast_to(linc, (tq, dh)))
            pv_parts.append(pv)

        m_new = jnp.concatenate(m_parts, axis=-1)                         # (tq, D)
        alpha = jnp.exp(m_prev - m_new)
        l_sc[...] = alpha * l_prev + jnp.concatenate(linc_parts, axis=-1)
        acc_sc[...] = alpha * acc_prev + jnp.concatenate(pv_parts, axis=-1)
        m_sc[...] = m_new

    # skip padded key tiles and fully-masked causal kv tiles
    if causal and need_kmask:
        gate = jnp.logical_and(kv_i * tkv < lk_valid,
                               kv_i * tkv <= q_i * tq + (tq - 1))
        pl.when(gate)(_body)
    elif causal:
        pl.when(kv_i * tkv <= q_i * tq + (tq - 1))(_body)
    elif need_kmask:
        pl.when(kv_i * tkv < lk_valid)(_body)
    else:
        _body()

    @pl.when(kv_i == pl.num_programs(2) - 1)
    def _finalize():
        o_ref[0] = (acc_sc[...] *
                    pl.reciprocal(l_sc[...], approx=True)).astype(o_ref.dtype)


def mha_attention(q, k, v, n_heads, causal, out_dtype=jnp.bfloat16):
    """q: (B, Lq, D), k/v: (B, Lk, D) with heads packed along D (no transposes)."""
    B, Lq, D = q.shape
    Lk = k.shape[1]
    dh = D // n_heads
    scale = 1.0 / math.sqrt(dh)

    def tile_len(L):
        Lp = _round_up(L, 8)
        if Lp > 128:
            return _round_up(L, 128), 128
        return Lp, Lp

    Lqp, tq = tile_len(Lq)
    Lkp, tkv = tile_len(Lk)

    def prep(t, Lp):
        t = t.astype(jnp.bfloat16)
        if Lp != t.shape[1]:
            t = jnp.pad(t, ((0, 0), (0, Lp - t.shape[1]), (0, 0)))
        return t

    qb, kb, vb = prep(q, Lqp), prep(k, Lkp), prep(v, Lkp)
    need_kmask = Lkp != Lk

    out = pl.pallas_call(
        functools.partial(_attn_kernel, scale=scale, causal=causal,
                          n_heads=n_heads, lk_valid=Lk, tq=tq, tkv=tkv,
                          need_kmask=need_kmask),
        out_shape=jax.ShapeDtypeStruct((B, Lqp, D), out_dtype),
        grid_spec=pltpu.PrefetchScalarGridSpec(
            num_scalar_prefetch=0,
            grid=(B, Lqp // tq, Lkp // tkv),
            in_specs=[
                pl.BlockSpec((1, tq, D), lambda b, qi, ki: (b, qi, 0)),
                pl.BlockSpec((1, tkv, D), lambda b, qi, ki: (b, ki, 0)),
                pl.BlockSpec((1, tkv, D), lambda b, qi, ki: (b, ki, 0)),
            ],
            out_specs=pl.BlockSpec((1, tq, D), lambda b, qi, ki: (b, qi, 0)),
            scratch_shapes=[pltpu.VMEM((tq, D), jnp.float32),
                            pltpu.VMEM((tq, D), jnp.float32),
                            pltpu.VMEM((tq, D), jnp.float32)],
        ),
        compiler_params=pltpu.CompilerParams(
            dimension_semantics=("parallel", "parallel", "arbitrary"),
        ),
    )(qb, kb, vb)
    if Lqp != Lq:
        out = out[:, :Lq, :]
    return out


# --------------------------------- LayerNorm --------------------------------------

def _ln_kernel(x_ref, g_ref, b_ref, o_ref, *, eps):
    x = x_ref[...]
    mu = jnp.mean(x, axis=-1, keepdims=True)
    xc = x - mu
    var = jnp.mean(xc * xc, axis=-1, keepdims=True)
    o_ref[...] = (xc * lax.rsqrt(var + eps) * g_ref[...] + b_ref[...]).astype(o_ref.dtype)


def layer_norm(x, g, b, eps=1e-5):
    lead = x.shape[:-1]
    D = x.shape[-1]
    M = 1
    for d in lead:
        M *= d
    x2 = x.reshape(M, D).astype(jnp.float32)
    Mp = _round_up(M, 8)
    tm = Mp
    if Mp > 512:
        Mp = _round_up(M, 512)
        tm = 512
    if Mp != M:
        x2 = jnp.pad(x2, ((0, Mp - M), (0, 0)))
    out = pl.pallas_call(
        functools.partial(_ln_kernel, eps=eps),
        out_shape=jax.ShapeDtypeStruct((Mp, D), jnp.float32),
        grid_spec=pltpu.PrefetchScalarGridSpec(
            num_scalar_prefetch=0,
            grid=(Mp // tm,),
            in_specs=[pl.BlockSpec((tm, D), lambda i: (i, 0)),
                      pl.BlockSpec((1, D), lambda i: (0, 0)),
                      pl.BlockSpec((1, D), lambda i: (0, 0))],
            out_specs=pl.BlockSpec((tm, D), lambda i: (i, 0)),
        ),
        compiler_params=pltpu.CompilerParams(dimension_semantics=("parallel",)),
    )(x2, g.reshape(1, D).astype(jnp.float32), b.reshape(1, D).astype(jnp.float32))
    return out[:M].reshape(*lead, D)


# ----------------------- series decomposition (moving average) --------------------

def _decomp_kernel(x_ref, *rest, kernel, pad, has_trend_in):
    if has_trend_in:
        t_ref, season_ref, trend_ref = rest
    else:
        season_ref, trend_ref = rest
        t_ref = None
    x = x_ref[...]                                          # (B, L, C) f32
    L = x.shape[1]
    front = x[:, :1, :]
    end = x[:, L - 1:L, :]
    # replicate padding done in-kernel: no padded HBM copy
    xpad = jnp.concatenate([front] * pad + [x] + [end] * pad, axis=1)
    acc = xpad[:, 0:L, :]
    for j in range(1, kernel):
        acc = acc + xpad[:, j:j + L, :]
    trend = acc * jnp.float32(1.0 / kernel)
    season_ref[...] = (x - trend).astype(season_ref.dtype)
    if t_ref is not None:
        trend = trend + t_ref[...]                          # fold trend accumulation
    trend_ref[...] = trend.astype(trend_ref.dtype)


def series_decomp(x, kernel, trend_add=None):
    """Returns (seasonal, trend [+ trend_add]) in one fused VPU kernel."""
    # TODO(synk): matches the reference exactly only for odd moving_avg kernels
    # (the reference pads (kernel-1)//2 on both sides).
    B, L, C = x.shape
    pad = (kernel - 1) // 2
    x = x.astype(jnp.float32)
    has_t = trend_add is not None
    in_specs = [pl.BlockSpec((B, L, C), lambda i: (0, 0, 0))]
    args = [x]
    if has_t:
        in_specs.append(pl.BlockSpec((B, L, C), lambda i: (0, 0, 0)))
        args.append(trend_add.astype(jnp.float32))
    season, trend = pl.pallas_call(
        functools.partial(_decomp_kernel, kernel=kernel, pad=pad, has_trend_in=has_t),
        out_shape=(jax.ShapeDtypeStruct((B, L, C), jnp.float32),
                   jax.ShapeDtypeStruct((B, L, C), jnp.float32)),
        grid_spec=pltpu.PrefetchScalarGridSpec(
            num_scalar_prefetch=0,
            grid=(1,),
            in_specs=in_specs,
            out_specs=[pl.BlockSpec((B, L, C), lambda i: (0, 0, 0)),
                       pl.BlockSpec((B, L, C), lambda i: (0, 0, 0))],
        ),
    )(*args)
    return season, trend


# ------------------------- k=3 convolutions (circular pad) ------------------------

def _conv3_kernel(xpad_ref, w_ref, b_ref, *rest, L, has_residual):
    if has_residual:
        r_ref, o_ref = rest
    else:
        (o_ref,) = rest
        r_ref = None
    # stack the three shifted slices -> one deeper (L, 3*Din) x (3*Din, Dout) matmul
    xc = jnp.concatenate([xpad_ref[0, pl.ds(0, L), :],
                          xpad_ref[0, pl.ds(1, L), :],
                          xpad_ref[0, pl.ds(2, L), :]], axis=-1)
    y = jnp.dot(xc, w_ref[...], preferred_element_type=jnp.float32) + b_ref[...]
    if r_ref is not None:
        y = y + r_ref[0]
    o_ref[0] = y.astype(o_ref.dtype)


def conv1d_k3_circular(x, w3, b, residual=None):
    """Conv1d(Din->Dout, k=3, circular pad 1) as one stacked matmul (+ residual)."""
    B, L, Din = x.shape
    Dout = w3.shape[-1]
    xpad = jnp.concatenate([x[:, -1:, :], x, x[:, :1, :]], axis=1).astype(jnp.bfloat16)
    w = w3.reshape(3 * Din, Dout).astype(jnp.bfloat16)
    has_r = residual is not None
    in_specs = [pl.BlockSpec((1, L + 2, Din), lambda bb: (bb, 0, 0)),
                pl.BlockSpec((3 * Din, Dout), lambda bb: (0, 0)),
                pl.BlockSpec((1, Dout), lambda bb: (0, 0))]
    args = [xpad, w, b.reshape(1, Dout).astype(jnp.float32)]
    if has_r:
        in_specs.append(pl.BlockSpec((1, L, Dout), lambda bb: (bb, 0, 0)))
        args.append(residual.astype(jnp.float32))
    return pl.pallas_call(
        functools.partial(_conv3_kernel, L=L, has_residual=has_r),
        out_shape=jax.ShapeDtypeStruct((B, L, Dout), jnp.float32),
        grid_spec=pltpu.PrefetchScalarGridSpec(
            num_scalar_prefetch=0, grid=(B,),
            in_specs=in_specs,
            out_specs=pl.BlockSpec((1, L, Dout), lambda bb: (bb, 0, 0)),
        ),
        compiler_params=pltpu.CompilerParams(dimension_semantics=("parallel",)),
    )(*args)


def _distil_conv_kernel(xpad_ref, w_ref, b_ref, o_ref, ybuf_ref, *, L, Lout):
    # Conv1d(k=3) as one stacked matmul + folded-BN bias + ELU + MaxPool1d(3,2,1), fused.
    xc = jnp.concatenate([xpad_ref[0, pl.ds(0, L), :],
                          xpad_ref[0, pl.ds(1, L), :],
                          xpad_ref[0, pl.ds(2, L), :]], axis=-1)
    y = jnp.dot(xc, w_ref[...], preferred_element_type=jnp.float32) + b_ref[...]
    y = jnp.where(y > 0, y, jnp.expm1(y))                      # ELU
    neg = jnp.full((1, y.shape[1]), -jnp.inf, jnp.float32)
    ybuf_ref[...] = jnp.concatenate([neg, y, neg], axis=0)     # pool padding = 1
    w0 = ybuf_ref[pl.ds(0, Lout, stride=2), :]
    w1 = ybuf_ref[pl.ds(1, Lout, stride=2), :]
    w2 = ybuf_ref[pl.ds(2, Lout, stride=2), :]
    o_ref[0] = jnp.maximum(jnp.maximum(w0, w1), w2).astype(o_ref.dtype)


def conv_layer(p, x):
    """Informer distil ConvLayer: Conv1d(k=3,circular) -> BatchNorm(eval) -> ELU -> MaxPool1d(3,2,1)."""
    B, L, D = x.shape
    Lout = (L - 1) // 2 + 1
    # TODO(synk): BatchNorm folded with default running stats (mean=0, var=1); fold real
    # running stats here when loading trained weights.
    s = 1.0 / math.sqrt(1.0 + 1e-5)
    xpad = jnp.concatenate([x[:, -1:, :], x, x[:, :1, :]], axis=1).astype(jnp.bfloat16)
    w = (p["w"] * s).reshape(3 * D, D).astype(jnp.bfloat16)
    b = (p["b"] * s).reshape(1, D).astype(jnp.float32)
    return pl.pallas_call(
        functools.partial(_distil_conv_kernel, L=L, Lout=Lout),
        out_shape=jax.ShapeDtypeStruct((B, Lout, D), jnp.float32),
        grid_spec=pltpu.PrefetchScalarGridSpec(
            num_scalar_prefetch=0, grid=(B,),
            in_specs=[pl.BlockSpec((1, L + 2, D), lambda bb: (bb, 0, 0)),
                      pl.BlockSpec((3 * D, D), lambda bb: (0, 0)),
                      pl.BlockSpec((1, D), lambda bb: (0, 0))],
            out_specs=pl.BlockSpec((1, Lout, D), lambda bb: (bb, 0, 0)),
            scratch_shapes=[pltpu.VMEM((L + 2, D), jnp.float32)],
        ),
        compiler_params=pltpu.CompilerParams(dimension_semantics=("parallel",)),
    )(xpad, w, b)


# ------------------------------- model pieces --------------------------------------

def positional_embedding(L, d_model):
    pos = jnp.arange(L, dtype=jnp.float32)[:, None]
    div = jnp.exp(jnp.arange(0, d_model, 2, dtype=jnp.float32)
                  * (-math.log(10000.0) / d_model))
    pe = jnp.zeros((L, d_model), dtype=jnp.float32)
    pe = pe.at[:, 0::2].set(jnp.sin(pos * div))
    pe = pe.at[:, 1::2].set(jnp.cos(pos * div))
    return pe


def spatial_encoder(p, x, x_mark):
    # TODO(synk): Spatial_Encoder source is not part of the provided module; approximated as
    # DataEmbedding-style value-projection + temporal-mark projection + fixed sinusoid,
    # fused into a single matmul over the concatenated [x, x_mark] features.
    xin = jnp.concatenate([x, x_mark], axis=-1)
    emb = linear(xin, p["w_emb"], p["b_emb"])
    pe = positional_embedding(x.shape[1], emb.shape[-1])
    return emb + pe[None]


def attention_layer(p, q_in, kv_in, n_heads, causal, residual=None):
    # TODO(synk): ProbAttention top-u query sampling has data-dependent gathers;
    # replaced with dense flash attention with the same masking semantics.
    B, Lq, D = q_in.shape
    if q_in is kv_in:                                   # fused Q,K,V projection
        qkv = linear(q_in, p["w_qkv"], p["b_qkv"], out_dtype=jnp.bfloat16)
        q, k, v = qkv[..., :D], qkv[..., D:2 * D], qkv[..., 2 * D:]
    else:                                               # fused K,V projection
        q = linear(q_in, p["w_qkv"][:, :D], p["b_qkv"][:D], out_dtype=jnp.bfloat16)
        kv = linear(kv_in, p["w_qkv"][:, D:], p["b_qkv"][D:], out_dtype=jnp.bfloat16)
        k, v = kv[..., :D], kv[..., D:]
    o = mha_attention(q, k, v, n_heads, causal)         # (B, Lq, D) bf16, heads packed
    return linear(o, p["wo"], p["bo"], residual=residual)


def encoder_layer(p, x, n_heads, moving_avg=25):
    x = attention_layer(p["attn"], x, x, n_heads, causal=False, residual=x)
    x, _ = series_decomp(x, moving_avg)
    z = ffn_residual(x, p["w1"], p["b1"], p["w2"], p["b2"])   # x + conv2(gelu(conv1(x)))
    res, _ = series_decomp(z, moving_avg)
    return res


def encoder(p, x, n_heads):
    n_layers = len(p["layers"])
    for i in range(n_layers - 1):
        x = encoder_layer(p["layers"][i], x, n_heads)
        x = conv_layer(p["convs"][i], x)
    x = encoder_layer(p["layers"][-1], x, n_heads)
    return layer_norm(x, p["norm_g"], p["norm_b"])


def decoder_layer(p, x, cross, trend, n_heads, moving_avg=25):
    x = attention_layer(p["self_attn"], x, x, n_heads, causal=True, residual=x)
    x, t1 = series_decomp(x, moving_avg)
    x = attention_layer(p["cross_attn"], x, cross, n_heads, causal=False, residual=x)
    x, t12 = series_decomp(x, moving_avg, trend_add=t1)
    z = ffn_residual(x, p["w1"], p["b1"], p["w2"], p["b2"])
    x, rt = series_decomp(z, moving_avg, trend_add=t12)       # rt = trend1+trend2+trend3
    # trend projection Conv1d(d_model -> c_out, k=3, circular, no bias) + running-trend add
    trend = conv1d_k3_circular(rt, p["w_trend"], p["b_trend_zero"], residual=trend)
    return x, trend


def decoder(p, x, cross, trend, n_heads):
    for lp in p["layers"]:
        x, trend = decoder_layer(lp, x, cross, trend, n_heads)
    x = layer_norm(x, p["norm_g"], p["norm_b"])
    return x, trend


def informer_forward(params, x_enc, x_mark_enc, x_dec, x_mark_dec, *,
                     pred_len, label_len, moving_avg, n_heads):
    mean = jnp.mean(x_enc, axis=1, keepdims=True)
    mean = jnp.repeat(mean, pred_len, axis=1)
    zeros = jnp.zeros((x_dec.shape[0], pred_len, x_dec.shape[2]), dtype=jnp.float32)
    seasonal_init, trend_init = series_decomp(x_enc, moving_avg)
    trend_init = jnp.concatenate([trend_init[:, -label_len:, :], mean], axis=1)
    seasonal_init = jnp.concatenate([seasonal_init[:, -label_len:, :], zeros], axis=1)
    dec_out = spatial_encoder(params["R_SE"], seasonal_init, x_mark_dec)
    enc_out = spatial_encoder(params["L_SE"], x_enc, x_mark_enc)
    enc_out = encoder(params["encoder"], enc_out, n_heads)
    seasonal_part, trend_part = decoder(params["decoder"], dec_out, enc_out, trend_init, n_heads)
    # final projection with the trend added in the matmul epilogue
    dec_out = linear(seasonal_part, params["proj_w"], params["proj_b"], residual=trend_part)
    return dec_out[:, -pred_len:, :]


# ------------------------------- parameter init ------------------------------------

class KeyGen:
    def __init__(self, key):
        self.key = key

    def __call__(self):
        self.key, sub = jax.random.split(self.key)
        return sub


def init_linear(kg, fan_in, fan_out):
    lim = 1.0 / math.sqrt(fan_in)
    w = jax.random.uniform(kg(), (fan_in, fan_out), jnp.float32, -lim, lim)
    b = jax.random.uniform(kg(), (fan_out,), jnp.float32, -lim, lim)
    return w, b


def init_attention(kg, d_model):
    wq, bq = init_linear(kg, d_model, d_model)
    wk, bk = init_linear(kg, d_model, d_model)
    wv, bv = init_linear(kg, d_model, d_model)
    wo, bo = init_linear(kg, d_model, d_model)
    return {"w_qkv": jnp.concatenate([wq, wk, wv], axis=1),
            "b_qkv": jnp.concatenate([bq, bk, bv], axis=0),
            "wo": wo, "bo": bo}


def init_conv3(kg, d_in, d_out):
    lim = 1.0 / math.sqrt(3 * d_in)
    w = jax.random.uniform(kg(), (3, d_in, d_out), jnp.float32, -lim, lim)
    b = jax.random.uniform(kg(), (d_out,), jnp.float32, -lim, lim)
    return w, b


def init_params(kg, *, enc_in, dec_in, c_out, vex_dim, mark_dim,
                d_model, d_ff, e_layers, d_layers):
    params = {}

    def se(in_dim):
        wv, bv = init_linear(kg, in_dim, d_model)
        wm, bm = init_linear(kg, mark_dim, d_model)
        return {"w_emb": jnp.concatenate([wv, wm], axis=0), "b_emb": bv + bm}

    params["L_SE"] = se(enc_in)
    params["R_SE"] = se(dec_in)

    enc_layers = []
    for _ in range(e_layers):
        w1, b1 = init_linear(kg, d_model, d_ff)
        w2, b2 = init_linear(kg, d_ff, d_model)
        enc_layers.append({"attn": init_attention(kg, d_model),
                           "w1": w1, "b1": b1, "w2": w2, "b2": b2})
    convs = []
    for _ in range(e_layers - 1):
        wc, bc = init_conv3(kg, d_model, d_model)
        convs.append({"w": wc, "b": bc})
    params["encoder"] = {"layers": enc_layers, "convs": convs,
                         "norm_g": jnp.ones((d_model,), jnp.float32),
                         "norm_b": jnp.zeros((d_model,), jnp.float32)}

    trend_dim = c_out * vex_dim
    dec_layers = []
    for _ in range(d_layers):
        w1, b1 = init_linear(kg, d_model, d_ff)
        w2, b2 = init_linear(kg, d_ff, d_model)
        wt, _ = init_conv3(kg, d_model, trend_dim)
        dec_layers.append({"self_attn": init_attention(kg, d_model),
                           "cross_attn": init_attention(kg, d_model),
                           "w1": w1, "b1": b1, "w2": w2, "b2": b2,
                           "w_trend": wt,
                           "b_trend_zero": jnp.zeros((trend_dim,), jnp.float32)})
    params["decoder"] = {"layers": dec_layers,
                         "norm_g": jnp.ones((d_model,), jnp.float32),
                         "norm_b": jnp.zeros((d_model,), jnp.float32)}

    pw, pb = init_linear(kg, d_model, trend_dim)
    params["proj_w"] = pw
    params["proj_b"] = pb
    return params


# --------------------------------------- main ---------------------------------------

if __name__ == "__main__":
    # small config consistent with the module's forward
    B = 2
    seq_len = 16
    label_len = 8
    pred_len = 8
    enc_in = dec_in = 8
    c_out = 8
    vex_dim = 1          # c_out * vex_dim == data feature dim so trend + seasonal add cleanly
    mark_dim = 5         # freq='t' -> 5 temporal marks
    d_model = 32
    n_heads = 4
    d_ff = 32
    e_layers = 2
    d_layers = 1
    args_moving_avg = 5  # args.moving_avg for the outer series_decomp

    root = jax.random.PRNGKey(0)
    k_in, k_params = jax.random.split(root)
    ki = jax.random.split(k_in, 4)
    x_enc = jax.random.normal(ki[0], (B, seq_len, enc_in), jnp.float32)
    x_mark_enc = jax.random.normal(ki[1], (B, seq_len, mark_dim), jnp.float32)
    x_dec = jax.random.normal(ki[2], (B, label_len + pred_len, dec_in), jnp.float32)
    x_mark_dec = jax.random.normal(ki[3], (B, label_len + pred_len, mark_dim), jnp.float32)

    kg = KeyGen(k_params)
    params = init_params(kg, enc_in=enc_in, dec_in=dec_in, c_out=c_out, vex_dim=vex_dim,
                         mark_dim=mark_dim, d_model=d_model, d_ff=d_ff,
                         e_layers=e_layers, d_layers=d_layers)

    out = informer_forward(params, x_enc, x_mark_enc, x_dec, x_mark_dec,
                           pred_len=pred_len, label_len=label_len,
                           moving_avg=args_moving_avg, n_heads=n_heads)
    out = jax.block_until_ready(out)
    assert out.shape == (B, pred_len, c_out * vex_dim), out.shape
    assert bool(jnp.all(jnp.isfinite(out)))
    print("KERNEL_OK")
</pallas_src>

<mosaic_0001>
module attributes {stable_mosaic.version = 11 : i64} {
  func.func @_decomp_kernel(%arg0: i32, %arg1: memref<2x16x8xf32, #tpu.memory_space<vmem>>, %arg2: memref<2x16x8xf32, #tpu.memory_space<vmem>>, %arg3: memref<2x16x8xf32, #tpu.memory_space<vmem>>) attributes {dimension_semantics = [#tpu.dimension_semantics<arbitrary>], iteration_bounds = array<i64: 1>, scalar_prefetch = 0 : i64, scratch_operands = 0 : i64, tpu.core_type = #tpu.core_type<tc>, window_params = [{pipeline_mode = #tpu.pipeline_mode<synchronous>, transform_indices = @transform_0, window_bounds = array<i64: 2, 16, 8>}, {pipeline_mode = #tpu.pipeline_mode<synchronous>, transform_indices = @transform_1, window_bounds = array<i64: 2, 16, 8>}, {pipeline_mode = #tpu.pipeline_mode<synchronous>, transform_indices = @transform_2, window_bounds = array<i64: 2, 16, 8>}]} {
    %c0 = arith.constant 0 : index
    %c0_0 = arith.constant 0 : index
    %c0_1 = arith.constant 0 : index
    %0 = vector.load %arg1[%c0, %c0_0, %c0_1] : memref<2x16x8xf32, #tpu.memory_space<vmem>>, vector<2x16x8xf32>
    %1 = vector.extract_strided_slice %0 {offsets = [0, 0, 0], sizes = [2, 1, 8], strides = [1, 1, 1]} : vector<2x16x8xf32> to vector<2x1x8xf32>
    %2 = vector.extract_strided_slice %0 {offsets = [0, 15, 0], sizes = [2, 1, 8], strides = [1, 1, 1]} : vector<2x16x8xf32> to vector<2x1x8xf32>
    %3 = tpu.concatenate %1, %1, %0, %2, %2 in 1 : vector<2x1x8xf32>, vector<2x1x8xf32>, vector<2x16x8xf32>, vector<2x1x8xf32>, vector<2x1x8xf32> -> vector<2x20x8xf32>
    %4 = vector.extract_strided_slice %3 {offsets = [0, 0, 0], sizes = [2, 16, 8], strides = [1, 1, 1]} : vector<2x20x8xf32> to vector<2x16x8xf32>
    %5 = vector.extract_strided_slice %3 {offsets = [0, 1, 0], sizes = [2, 16, 8], strides = [1, 1, 1]} : vector<2x20x8xf32> to vector<2x16x8xf32>
    %6 = arith.addf %4, %5 : vector<2x16x8xf32>
    %7 = vector.extract_strided_slice %3 {offsets = [0, 2, 0], sizes = [2, 16, 8], strides = [1, 1, 1]} : vector<2x20x8xf32> to vector<2x16x8xf32>
    %8 = arith.addf %6, %7 : vector<2x16x8xf32>
    %9 = vector.extract_strided_slice %3 {offsets = [0, 3, 0], sizes = [2, 16, 8], strides = [1, 1, 1]} : vector<2x20x8xf32> to vector<2x16x8xf32>
    %10 = arith.addf %8, %9 : vector<2x16x8xf32>
    %11 = vector.extract_strided_slice %3 {offsets = [0, 4, 0], sizes = [2, 16, 8], strides = [1, 1, 1]} : vector<2x20x8xf32> to vector<2x16x8xf32>
    %12 = arith.addf %10, %11 : vector<2x16x8xf32>
    %cst = arith.constant 2.000000e-01 : f32
    %13 = vector.broadcast %cst : f32 to vector<2x16x8xf32>
    %14 = arith.mulf %12, %13 : vector<2x16x8xf32>
    %15 = arith.subf %0, %14 : vector<2x16x8xf32>
    %c0_2 = arith.constant 0 : index
    %c0_3 = arith.constant 0 : index
    %c0_4 = arith.constant 0 : index
    %16 = vector.load %arg2[%c0_2, %c0_3, %c0_4] : memref<2x16x8xf32, #tpu.memory_space<vmem>>, vector<2x16x8xf32>
    tpu.vector_store %arg2[%c0_2, %c0_3, %c0_4], %15 {strides = array<i32>} : memref<2x16x8xf32, #tpu.memory_space<vmem>>, vector<2x16x8xf32>,
    %c0_5 = arith.constant 0 : index
    %c0_6 = arith.constant 0 : index
    %c0_7 = arith.constant 0 : index
    %17 = vector.load %arg3[%c0_5, %c0_6, %c0_7] : memref<2x16x8xf32, #tpu.memory_space<vmem>>, vector<2x16x8xf32>
    tpu.vector_store %arg3[%c0_5, %c0_6, %c0_7], %14 {strides = array<i32>} : memref<2x16x8xf32, #tpu.memory_space<vmem>>, vector<2x16x8xf32>,
    return
  }
  func.func @transform_0(%arg0: i32) -> (i32, i32, i32) {
    %c0_i32 = arith.constant 0 : i32
    %c0_i32_0 = arith.constant 0 : i32
    %c0_i32_1 = arith.constant 0 : i32
    %c0_i32_2 = arith.constant 0 : i32
    return %c0_i32, %c0_i32_0, %c0_i32_1 : i32, i32, i32
  }
  func.func @transform_1(%arg0: i32) -> (i32, i32, i32) {
    %c0_i32 = arith.constant 0 : i32
    %c0_i32_0 = arith.constant 0 : i32
    %c0_i32_1 = arith.constant 0 : i32
    %c0_i32_2 = arith.constant 0 : i32
    return %c0_i32, %c0_i32_0, %c0_i32_1 : i32, i32, i32
  }
  func.func @transform_2(%arg0: i32) -> (i32, i32, i32) {
    %c0_i32 = arith.constant 0 : i32
    %c0_i32_0 = arith.constant 0 : i32
    %c0_i32_1 = arith.constant 0 : i32
    %c0_i32_2 = arith.constant 0 : i32
    return %c0_i32, %c0_i32_0, %c0_i32_1 : i32, i32, i32
  }
}

</mosaic_0001>

<bundles_post_ra>
// kernel: tpu_custom_call.1
= control target key start
LH: loop header
LB: loop body
LE: loop exit
PB: predicated region body
PF: predicated region fallthrough
CT: control target
= control target key end

     0   :  { %vm22_vm0 = vcmask 1041408   ;;  %vm43_vm1 = vcmask 1040384   ;;  %vm57_vm2 = vcmask 1046528   ;;  %vm76_vm3 = vcmask 1045504   ;;  %s267_s0 = inlined_call_operand.vmem [shape: f32[2,16,8], index: 0, kind: input, shape index: {}]   ;;  %s268_s2 = inlined_call_operand.vmem [shape: f32[2,16,8], index: 2, kind: output, shape index: {1}]   ;;  %s269_s1 = inlined_call_operand.vmem [shape: f32[2,16,8], index: 1, kind: output, shape index: {0}]  }
   0x1   :  { %v176_v0 = vld [vmem:[%s267_s0] sm:$0xff]  ;;  %v181_v1 = vld [vmem:[%s267_s0 + $0x8] sm:$0xff]  ;;  %v186_v2 = vld [vmem:[%s267_s0 + $0x18] sm:$0xff]  ;;  %vm95_vm4 = vcmask 1044480   ;;  %vm114_vm5 = vcmask 1043456   ;;  %vm50_vm6 = vcmask 1042432  }
   0x2   :  { %v16_v3 = vrot.slane %v176_v0, 7  ;;  %v23_v4 = vrot.slane %v176_v0, 6  ;;  %v24_v5 = vrot.slane %v181_v1, 6  ;;  %v27_v6 = vrot.slane %v186_v2, 6  ;;  %v195_v7 = vld [vmem:[%s267_s0 + $0x10] sm:$0xff] }
   0x3   :  { %v35_v8 = vrot.slane %v181_v1, 5  ;;  %v36_v9 = vrot.slane %v186_v2, 5  ;;  %v39_v10 = vrot.slane %v181_v1, 4  ;;  %v40_v11 = vrot.slane %v186_v2, 4 }
   0x4   :  { %v25_v12 = vsel %vm22_vm0, %v23_v4, %v24_v5  ;;  %v44_v13 = vsel %vm43_vm1, %v176_v0, %v16_v3  ;;  %v17_v14 = vrot.slane %v195_v7, 7  ;;  %v26_v25 = vrot.slane %v195_v7, 6 }
   0x5   :  { %v46_v15 = vsel %vm22_vm0, %v44_v13, %v23_v4  ;;  %v59_v16 = vrot.slane %v25_v12, 1  ;;  %v78_v17 = vrot.slane %v25_v12, 2  ;;  %v97_v18 = vrot.slane %v25_v12, 3 }
   0x6   :  { %v58_v19 = vrot.slane %v46_v15, 1  ;;  %v77_v20 = vrot.slane %v46_v15, 2  ;;  %v96_v21 = vrot.slane %v46_v15, 3  ;;  %v115_v22 = vrot.slane %v46_v15, 4 }
   0x7   :  { %v116_v23 = vrot.slane %v25_v12, 4  ;;  %v48_v24 = vsel %vm22_vm0, %v24_v5, %v35_v8  ;;  %v45_v26 = vsel %vm43_vm1, %v195_v7, %v17_v14  ;;  %v28_v37 = vsel %vm22_vm0, %v26_v25, %v27_v6 }
   0x8   :  { %v60_v27 = vsel %vm57_vm2, %v58_v19, %v59_v16  ;;  %v79_v28 = vsel %vm76_vm3, %v77_v20, %v78_v17  ;;  %v98_v29 = vsel %vm95_vm4, %v96_v21, %v97_v18  ;;  %v51_v30 = vsel %vm50_vm6, %v48_v24, %v39_v10 }
   0x9   :  { %v72_v31 = vadd.f32 %v60_v27, %v46_v15  ;;  %v117_v32 = vsel %vm114_vm5, %v115_v22, %v116_v23  ;;  %v61_v33 = vrot.slane %v51_v30, 1  ;;  %v80_v34 = vrot.slane %v51_v30, 2 }
   0xa   :  { %v99_v35 = vrot.slane %v51_v30, 3  ;;  %v118_v36 = vrot.slane %v51_v30, 4  ;;  %v47_v38 = vsel %vm22_vm0, %v45_v26, %v26_v25  ;;  %v64_v46 = vrot.slane %v28_v37, 1 }
   0xb   :  { %v91_v39 = vadd.f32 %v79_v28, %v72_v31  ;;  %v62_v40 = vsel %vm57_vm2, %v59_v16, %v61_v33  ;;  %v81_v41 = vsel %vm76_vm3, %v78_v17, %v80_v34  ;;  %v63_v42 = vrot.slane %v47_v38, 1 }
   0xc   :  { %v73_v43 = vadd.f32 %v62_v40, %v25_v12  ;;  %v100_v44 = vsel %vm95_vm4, %v97_v18, %v99_v35  ;;  %v119_v45 = vsel %vm114_vm5, %v116_v23, %v118_v36  ;;  %v82_v48 = vrot.slane %v47_v38, 2 }
   0xd   :  { %v110_v47 = vadd.f32 %v98_v29, %v91_v39  ;;  %v83_v49 = vrot.slane %v28_v37, 2  ;;  %v101_v50 = vrot.slane %v47_v38, 3  ;;  %v65_v52 = vsel %vm57_vm2, %v63_v42, %v64_v46 }
   0xe   :  { %v92_v51 = vadd.f32 %v81_v41, %v73_v43  ;;  %v102_v53 = vrot.slane %v28_v37, 3  ;;  %v120_v54 = vrot.slane %v47_v38, 4  ;;  %v74_v56 = vadd.f32 %v65_v52, %v47_v38 }
   0xf   :  { %v129_v55 = vadd.f32 %v117_v32, %v110_v47  ;;  %v84_v57 = vsel %vm76_vm3, %v82_v48, %v83_v49  ;;  %v121_v58 = vrot.slane %v28_v37, 4  ;;  %vm141_vm7 = vcmask 64512  }
  0x10   :  { %v111_v59 = vadd.f32 %v100_v44, %v92_v51  ;;  %v103_v60 = vsel %vm95_vm4, %v101_v50, %v102_v53  ;;  %v49_v61 = vsel %vm22_vm0, %v27_v6, %v36_v9  ;;  %v93_v63 = vadd.f32 %v84_v57, %v74_v56 }
  0x11   :  { %v133_v62 = vmul.f32 0.2, %v129_v55  ;;  %v122_v3 = vsel %vm114_vm5, %v120_v54, %v121_v58  ;;  %v52_v4 = vsel %vm50_vm6, %v49_v61, %v40_v11 }
  0x12   :  { %v130_v5 = vadd.f32 %v119_v45, %v111_v59  ;;  %v66_v8 = vrot.slane %v52_v4, 1  ;;  %v85_v10 = vrot.slane %v52_v4, 2  ;;  %v104_v12 = vrot.slane %v52_v4, 3 }
  0x13   :  { %v137_v13 = vsub.f32 %v176_v0, %v133_v62  ;;  %v112_v14 = vadd.f32 %v103_v60, %v93_v63  ;;  %146 = vst.msk [vmem:[%s268_s2] sm:$0xff] %vm141_vm7, %v133_v62  ;;  %v123_v16 = vrot.slane %v52_v4, 4 }
  0x14   :  { %v134_v15 = vmul.f32 0.2, %v130_v5  ;;  %v67_v6 = vsel %vm57_vm2, %v64_v46, %v66_v8  ;;  %v86_v9 = vsel %vm76_vm3, %v83_v49, %v85_v10  ;;  %v105_v18 = vsel %vm95_vm4, %v102_v53, %v104_v12 }
  0x15   :  { %142 = vst.msk [vmem:[%s269_s1] sm:$0xff] %vm141_vm7, %v137_v13  ;;  %v131_v11 = vadd.f32 %v122_v3, %v112_v14  ;;  %v75_v17 = vadd.f32 %v67_v6, %v28_v37  ;;  %v124_v21 = vsel %vm114_vm5, %v121_v58, %v123_v16 }
  0x16   :  { %v138_v0 = vsub.f32 %v181_v1, %v134_v15  ;;  %147 = vst.msk [vmem:[%s268_s2 + $0x8] sm:$0xff] %vm141_vm7, %v134_v15 }
  0x17   :  { %v135_v19 = vmul.f32 0.2, %v131_v11  ;;  %v94_v20 = vadd.f32 %v86_v9, %v75_v17 }
  0x18   :  { %143 = vst.msk [vmem:[%s269_s1 + $0x8] sm:$0xff] %vm141_vm7, %v138_v0 }
  0x19   :  { %v139_v22 = vsub.f32 %v195_v7, %v135_v19  ;;  %v113_v23 = vadd.f32 %v105_v18, %v94_v20  ;;  %148 = vst.msk [vmem:[%s268_s2 + $0x10] sm:$0xff] %vm141_vm7, %v135_v19 }
  0x1b   :  { %144 = vst.msk [vmem:[%s269_s1 + $0x10] sm:$0xff] %vm141_vm7, %v139_v22  ;;  %v132_v1 = vadd.f32 %v124_v21, %v113_v23 }
  0x1d   :  { %v136_v24 = vmul.f32 0.2, %v132_v1 }
  0x1f   :  { %v140_v25 = vsub.f32 %v186_v2, %v136_v24  ;;  %149 = vst.msk [vmem:[%s268_s2 + $0x18] sm:$0xff] %vm141_vm7, %v136_v24 }
  0x21   :  { %145 = vst.msk [vmem:[%s269_s1 + $0x18] sm:$0xff] %vm141_vm7, %v140_v25 }

</bundles_post_ra>
